<compile_context>
chip_gen: v6e
topology: v6e:2x2x1
jax: 0.10.0
libtpu: 0.0.40
codegen_flags: <defaults>
</compile_context>

<pallas_src>
import jax
import jax.numpy as jnp
from jax import lax
from jax.experimental import pallas as pl
from jax.experimental.pallas import tpu as pltpu

NULL_ATTENTION = float(-(2 ** 22))


def _round_up(x, m):
    return (x + m - 1) // m * m


def _lane_pad(x, target):
    """Zero-pad the last (lane) dim of `x` up to `target` columns."""
    pad = target - x.shape[-1]
    if pad == 0:
        return x
    return jnp.concatenate(
        [x, jnp.zeros(x.shape[:-1] + (pad,), dtype=x.dtype)], axis=-1)


def _coatt_kernel(sl_ref, hl_ref,                    # VMEM i32 [Bt, 1] lengths
                  item_ref, xsess_ref, hist_ref,     # VMEM f32 inputs
                  w1i_ref, w1s_ref, b1_ref,          # fc1 params (split weight, bf16)
                  rep_ref, score_ref):               # VMEM outputs (lane-padded)
    bt, s_len, dim = xsess_ref.shape
    h_len = hist_ref.shape[1]

    item = item_ref[...]                             # [Bt, dim] f32
    xsess = xsess_ref[...]                           # [Bt, s_len, dim] f32
    hist = hist_ref[...]                             # [Bt, h_len, dim] f32
    hist_b = hist.astype(jnp.bfloat16)
    w1i = w1i_ref[...]                               # [dim, dim] bf16
    w1s = w1s_ref[...]                               # [dim, dim] bf16

    # fc1 split: fc1(concat([item, x_session], -1)) ==
    #            item @ W_item + x_session @ W_sess + b1   (no concat copy).
    # MXU operands in bf16 (native), accumulation in f32.
    item_proj = jnp.dot(item.astype(jnp.bfloat16), w1i,
                        preferred_element_type=jnp.float32) + b1_ref[...]    # [Bt, dim]
    if s_len % 8 == 0:
        # (Bt, s_len) -> (Bt*s_len) collapse is a layout no-op for f32 when
        # s_len % 8 == 0, so fc1 becomes one big [Bt*s_len, dim] GEMM.
        q = jnp.dot(xsess.reshape(bt * s_len, dim).astype(jnp.bfloat16), w1s,
                    preferred_element_type=jnp.float32).reshape(bt, s_len, dim)
    else:
        q = jnp.einsum('bsd,df->bsf', xsess.astype(jnp.bfloat16), w1s,
                       preferred_element_type=jnp.float32)
    query = q + item_proj[:, None, :]                                        # [Bt, s_len, dim]

    # att[b,s,h] = <query[b,s,:], hist[b,h,:]>  (bf16 MXU, f32 accumulate).
    # hist's contracting dim is already minor, so the MXU operand orientation
    # handles it without an explicit XLU transpose of the [h_len, dim] tiles.
    att = jnp.einsum('bsd,bhd->bsh', query.astype(jnp.bfloat16), hist_b,
                     preferred_element_type=jnp.float32)                     # [Bt, s_len, h_len]

    # Session mask on the 3-D att (before the max); hist mask on the 2-D score
    # (after the max) — mathematically identical, saves one full 3-D iota +
    # compare + select on the largest intermediate.
    s_idx = lax.broadcasted_iota(jnp.int32, (bt, s_len, h_len), 1)
    att = jnp.where(s_idx < sl_ref[...][:, :, None], att, NULL_ATTENTION)

    score = jnp.max(att, axis=1)                                             # [Bt, h_len]
    h_idx = lax.broadcasted_iota(jnp.int32, (bt, h_len), 1)
    score = jnp.where(h_idx < hl_ref[...], score, NULL_ATTENTION)

    # softmax over the history axis (VPU + EUP)
    m = jnp.max(score, axis=1, keepdims=True)
    e = jnp.exp(score - m)
    p = e * pl.reciprocal(jnp.sum(e, axis=1, keepdims=True), approx=True)    # [Bt, h_len]

    # user_hist_rep[b,d] = sum_h p[b,h] * user_hist[b,h,d]
    if h_len >= 128 and dim >= 128:
        # Large tiles: MXU matvec batch, avoids the [Bt, h_len, dim] temporary.
        rep = jnp.einsum('bh,bhd->bd', p.astype(jnp.bfloat16), hist_b,
                         preferred_element_type=jnp.float32)
    else:
        # Small tiles: VPU broadcast-mul + sublane reduce.
        rep = jnp.sum(p[:, :, None] * hist, axis=1)                          # [Bt, dim]

    # Lane-dense stores: output blocks are padded up to a multiple of 128 lanes
    # so the writes lower to full `vst` (not masked vst.msk); wrapper slices.
    score_ref[...] = _lane_pad(score, score_ref.shape[-1])
    rep_ref[...] = _lane_pad(rep, rep_ref.shape[-1])


def _choose_block_rows(B_pad, s_len, h_len, dim, dim_pad, h_pad):
    """Batch tile Bt: multiple of 8, divides B_pad, sized from a VMEM budget."""
    # Conservative per-row VMEM bytes: double-buffered f32 inputs + lane-padded
    # outputs, plus the live in-kernel intermediates.
    per_row = 8 * (dim + s_len * dim + h_len * dim + 2)   # f32 inputs, 2 buffers
    per_row += 8 * (dim_pad + h_pad)                      # f32 outputs, 2 buffers
    per_row += 6 * s_len * dim                            # query f32 + bf16 copy
    per_row += 2 * h_len * dim                            # hist bf16 copy
    per_row += 4 * s_len * h_len                          # att f32
    per_row += 4 * h_len * dim                            # p*hist temporary (VPU path)
    weights = 2 * (2 * (2 * dim * dim) + 4 * dim)         # bf16 fc1 halves + f32 bias, 2 buffers
    budget = (36 << 20) - weights                         # fits 48 MiB scoped VMEM everywhere
    bt = max(8, min(budget // per_row, B_pad) // 8 * 8)
    # Prefer >= 2 grid tiles so the "parallel" batch axis can be split across
    # the two v7x TensorCores, unless halving starves the fc1 GEMM's M = Bt*s_len.
    if B_pad >= 16 and B_pad // bt < 2:
        half = max(8, (B_pad // 2) // 8 * 8)
        if half * s_len >= 256:
            bt = half
    while B_pad % bt:                                     # B_pad is a multiple of 8
        bt -= 8
    return bt


@jax.jit
def coatt_forward(item_emb, x_session, session_len, user_hist, hist_len, w1, b1):
    B, s_len, dim = x_session.shape
    h_len = user_hist.shape[1]
    dim_pad = _round_up(dim, 128)     # lane-dense output widths
    h_pad = _round_up(h_len, 128)

    # Pad the batch only to the next multiple of 8 (sublane).  When B % 8 == 0
    # (typical real workloads) this copy is skipped entirely; padded rows get
    # length 0 (fully masked) and are sliced away below.
    B_pad = _round_up(B, 8)
    pad = B_pad - B
    if pad:
        item_emb = jnp.pad(item_emb, ((0, pad), (0, 0)))
        x_session = jnp.pad(x_session, ((0, pad), (0, 0), (0, 0)))
        user_hist = jnp.pad(user_hist, ((0, pad), (0, 0), (0, 0)))
        session_len = jnp.pad(session_len, ((0, pad),))
        hist_len = jnp.pad(hist_len, ((0, pad),))

    Bt = _choose_block_rows(B_pad, s_len, h_len, dim, dim_pad, h_pad)

    sl2 = session_len.astype(jnp.int32).reshape(B_pad, 1)
    hl2 = hist_len.astype(jnp.int32).reshape(B_pad, 1)
    # fc1 weight split (torch W^T stored as [2*dim, dim]); cast weights to bf16
    # once in the wrapper (tiny arrays), keep the bias in f32.
    w1_item = w1[:dim, :].astype(jnp.bfloat16)
    w1_sess = w1[dim:, :].astype(jnp.bfloat16)
    b1_2d = b1.reshape(1, dim).astype(jnp.float32)

    grid_spec = pltpu.PrefetchScalarGridSpec(
        num_scalar_prefetch=0,
        grid=(B_pad // Bt,),
        in_specs=[
            pl.BlockSpec((Bt, 1), lambda i: (i, 0)),              # session_len
            pl.BlockSpec((Bt, 1), lambda i: (i, 0)),              # hist_len
            pl.BlockSpec((Bt, dim), lambda i: (i, 0)),            # item_emb
            pl.BlockSpec((Bt, s_len, dim), lambda i: (i, 0, 0)),  # x_session
            pl.BlockSpec((Bt, h_len, dim), lambda i: (i, 0, 0)),  # user_hist
            pl.BlockSpec((dim, dim), lambda i: (0, 0)),           # fc1 W (item half)
            pl.BlockSpec((dim, dim), lambda i: (0, 0)),           # fc1 W (session half)
            pl.BlockSpec((1, dim), lambda i: (0, 0)),             # fc1 bias
        ],
        out_specs=[
            pl.BlockSpec((Bt, dim_pad), lambda i: (i, 0)),        # user_hist_rep (lane-padded)
            pl.BlockSpec((Bt, h_pad), lambda i: (i, 0)),          # score (lane-padded)
        ],
    )

    rep, score = pl.pallas_call(
        _coatt_kernel,
        grid_spec=grid_spec,
        out_shape=(
            jax.ShapeDtypeStruct((B_pad, dim_pad), jnp.float32),
            jax.ShapeDtypeStruct((B_pad, h_pad), jnp.float32),
        ),
        compiler_params=pltpu.CompilerParams(
            dimension_semantics=("parallel",),
            vmem_limit_bytes=48 * 1024 * 1024),
    )(sl2, hl2, item_emb, x_session, user_hist, w1_item, w1_sess, b1_2d)

    return rep[:B, :dim], score[:B, :h_len]


def coatt_reference(item_emb, x_session, session_len, user_hist, hist_len, w1, b1):
    """Pure-JAX f32 replica of the PyTorch forward (for verification)."""
    B, s_len, dim = x_session.shape
    h_len = user_hist.shape[1]
    user_hist_tile = jnp.tile(user_hist.reshape(B, 1, h_len, dim), (1, s_len, 1, 1))
    x_session_tile = jnp.tile(x_session.reshape(B, s_len, 1, dim), (1, 1, h_len, 1))
    item_emb_tile = jnp.tile(item_emb.reshape(B, 1, 1, dim), (1, s_len, h_len, 1))
    query = jnp.concatenate([item_emb_tile, x_session_tile], axis=3) @ w1 + b1
    att_score = jnp.sum(user_hist_tile * query, axis=3)
    mask_session = (jnp.arange(s_len)[None, :] < session_len[:, None])
    mask_session = jnp.tile(mask_session.reshape(B, s_len, 1), (1, 1, h_len))
    mask_hist = (jnp.arange(h_len)[None, :] < hist_len[:, None])
    mask_hist = jnp.tile(mask_hist.reshape(B, 1, h_len), (1, s_len, 1))
    att_score = jnp.where(mask_session, att_score, NULL_ATTENTION)
    att_score = jnp.where(mask_hist, att_score, NULL_ATTENTION)
    score = jnp.max(att_score, axis=1)                       # [B, h_len]
    att = jax.nn.softmax(score, axis=1)
    user_hist_rep = jnp.sum(user_hist * att[:, :, None], axis=1)
    return user_hist_rep, score


if __name__ == "__main__":
    B, s_len, h_len, dim = 2, 8, 8, 32

    key = jax.random.PRNGKey(0)
    k_item, k_sess, k_hist, k_w, k_b = jax.random.split(key, 5)

    item_emb = jax.random.normal(k_item, (B, dim), dtype=jnp.float32)
    x_session = jax.random.normal(k_sess, (B, s_len, dim), dtype=jnp.float32)
    user_hist = jax.random.normal(k_hist, (B, h_len, dim), dtype=jnp.float32)
    session_len = jnp.array([5, 8], dtype=jnp.int32)
    hist_len = jnp.array([6, 3], dtype=jnp.int32)

    # fc1: Linear(2*dim -> dim); weight stored as [2*dim, dim] (torch W^T)
    bound = 1.0 / jnp.sqrt(2.0 * dim)
    w1 = jax.random.uniform(k_w, (2 * dim, dim), jnp.float32, -bound, bound)
    b1 = jax.random.uniform(k_b, (dim,), jnp.float32, -bound, bound)

    rep, score = coatt_forward(item_emb, x_session, session_len,
                               user_hist, hist_len, w1, b1)
    jax.block_until_ready((rep, score))

    rep_ref, score_ref = coatt_reference(item_emb, x_session, session_len,
                                         user_hist, hist_len, w1, b1)
    # bf16 MXU operands (f32 accumulation) plus the approx softmax reciprocal
    # change the numerics vs the pure-f32 reference by O(1e-2) absolute;
    # tolerances account for that while still catching structural errors.
    assert jnp.allclose(score, score_ref, atol=1.5e-1, rtol=2e-2), "score mismatch"
    assert jnp.allclose(rep, rep_ref, atol=2.5e-1, rtol=2e-2), "user_hist_rep mismatch"

    print("KERNEL_OK")
</pallas_src>

<mosaic_0001>
module attributes {stable_mosaic.version = 11 : i64} {
  func.func @_coatt_kernel(%arg0: i32, %arg1: memref<8x1xi32, #tpu.memory_space<vmem>>, %arg2: memref<8x1xi32, #tpu.memory_space<vmem>>, %arg3: memref<8x32xf32, #tpu.memory_space<vmem>>, %arg4: memref<8x8x32xf32, #tpu.memory_space<vmem>>, %arg5: memref<8x8x32xf32, #tpu.memory_space<vmem>>, %arg6: memref<32x32xbf16, #tpu.memory_space<vmem>>, %arg7: memref<32x32xbf16, #tpu.memory_space<vmem>>, %arg8: memref<1x32xf32, #tpu.memory_space<vmem>>, %arg9: memref<8x128xf32, #tpu.memory_space<vmem>>, %arg10: memref<8x128xf32, #tpu.memory_space<vmem>>) attributes {dimension_semantics = [#tpu.dimension_semantics<parallel>], iteration_bounds = array<i64: 1>, scalar_prefetch = 0 : i64, scratch_operands = 0 : i64, tpu.core_type = #tpu.core_type<tc>, window_params = [{transform_indices = @transform_0, window_bounds = array<i64: 8, 1>}, {transform_indices = @transform_1, window_bounds = array<i64: 8, 1>}, {transform_indices = @transform_2, window_bounds = array<i64: 8, 32>}, {transform_indices = @transform_3, window_bounds = array<i64: 8, 8, 32>}, {transform_indices = @transform_4, window_bounds = array<i64: 8, 8, 32>}, {pipeline_mode = #tpu.pipeline_mode<synchronous>, transform_indices = @transform_5, window_bounds = array<i64: 32, 32>}, {pipeline_mode = #tpu.pipeline_mode<synchronous>, transform_indices = @transform_6, window_bounds = array<i64: 32, 32>}, {pipeline_mode = #tpu.pipeline_mode<synchronous>, transform_indices = @transform_7, window_bounds = array<i64: 1, 32>}, {transform_indices = @transform_8, window_bounds = array<i64: 8, 128>}, {transform_indices = @transform_9, window_bounds = array<i64: 8, 128>}]} {
    %c0 = arith.constant 0 : index
    %c0_0 = arith.constant 0 : index
    %0 = vector.load %arg3[%c0, %c0_0] : memref<8x32xf32, #tpu.memory_space<vmem>>, vector<8x32xf32>
    %c0_1 = arith.constant 0 : index
    %c0_2 = arith.constant 0 : index
    %c0_3 = arith.constant 0 : index
    %1 = vector.load %arg4[%c0_1, %c0_2, %c0_3] : memref<8x8x32xf32, #tpu.memory_space<vmem>>, vector<8x8x32xf32>
    %c0_4 = arith.constant 0 : index
    %c0_5 = arith.constant 0 : index
    %c0_6 = arith.constant 0 : index
    %2 = vector.load %arg5[%c0_4, %c0_5, %c0_6] : memref<8x8x32xf32, #tpu.memory_space<vmem>>, vector<8x8x32xf32>
    %3 = arith.truncf %2 : vector<8x8x32xf32> to vector<8x8x32xbf16>
    %c0_7 = arith.constant 0 : index
    %c0_8 = arith.constant 0 : index
    %4 = vector.load %arg6[%c0_7, %c0_8] : memref<32x32xbf16, #tpu.memory_space<vmem>>, vector<32x32xbf16>
    %c0_9 = arith.constant 0 : index
    %c0_10 = arith.constant 0 : index
    %5 = vector.load %arg7[%c0_9, %c0_10] : memref<32x32xbf16, #tpu.memory_space<vmem>>, vector<32x32xbf16>
    %6 = arith.truncf %0 : vector<8x32xf32> to vector<8x32xbf16>
    %cst = arith.constant dense<0.000000e+00> : vector<8x32xf32>
    %7 = tpu.matmul %6, %4, %cst {dimension_numbers = #tpu.dot_dimension_numbers<[1], [0], [0], [1], [0, 0, 1, 1], [], []>} : vector<8x32xbf16>, vector<32x32xbf16>, vector<8x32xf32> -> vector<8x32xf32>
    %c0_11 = arith.constant 0 : index
    %c0_12 = arith.constant 0 : index
    %8 = vector.load %arg8[%c0_11, %c0_12] : memref<1x32xf32, #tpu.memory_space<vmem>>, vector<1x32xf32>
    %9 = vector.broadcast %8 : vector<1x32xf32> to vector<8x32xf32>
    %10 = arith.addf %7, %9 : vector<8x32xf32>
    %11 = vector.shape_cast %1 : vector<8x8x32xf32> to vector<64x32xf32>
    %12 = arith.truncf %11 : vector<64x32xf32> to vector<64x32xbf16>
    %cst_13 = arith.constant dense<0.000000e+00> : vector<64x32xf32>
    %13 = tpu.matmul %12, %5, %cst_13 {dimension_numbers = #tpu.dot_dimension_numbers<[1], [0], [0], [1], [0, 0, 1, 1], [], []>} : vector<64x32xbf16>, vector<32x32xbf16>, vector<64x32xf32> -> vector<64x32xf32>
    %14 = vector.shape_cast %13 : vector<64x32xf32> to vector<8x8x32xf32>
    %15 = vector.shape_cast %10 : vector<8x32xf32> to vector<8x1x32xf32>
    %16 = vector.broadcast %15 : vector<8x1x32xf32> to vector<8x8x32xf32>
    %17 = arith.addf %14, %16 : vector<8x8x32xf32>
    %18 = arith.truncf %17 : vector<8x8x32xf32> to vector<8x8x32xbf16>
    "tpu.trace_start"() <{level = 10 : i32, message = "bsd,bhd->bsh"}> : () -> ()
    %cst_14 = arith.constant dense<0.000000e+00> : vector<8x8x8xf32>
    %19 = tpu.matmul %18, %3, %cst_14 {dimension_numbers = #tpu.dot_dimension_numbers<[2], [2], [1], [1], [0, 0, 0, 1, 1, 1], [0], [0]>} : vector<8x8x32xbf16>, vector<8x8x32xbf16>, vector<8x8x8xf32> -> vector<8x8x8xf32>
    "tpu.trace_stop"() : () -> ()
    %20 = tpu.iota {dimensions = array<i32: 1>} : vector<8x8x8xi32>
    %c0_15 = arith.constant 0 : index
    %c0_16 = arith.constant 0 : index
    %21 = vector.load %arg1[%c0_15, %c0_16] : memref<8x1xi32, #tpu.memory_space<vmem>>, vector<8x1xi32>
    %22 = vector.shape_cast %21 : vector<8x1xi32> to vector<8x1x1xi32>
    %23 = vector.broadcast %22 : vector<8x1x1xi32> to vector<8x8x8xi32>
    %24 = arith.cmpi slt, %20, %23 : vector<8x8x8xi32>
    %cst_17 = arith.constant 0xCA800000 : f32
    %25 = vector.broadcast %cst_17 : f32 to vector<8x8x8xf32>
    %26 = arith.select %24, %19, %25 : vector<8x8x8xi1>, vector<8x8x8xf32>
    %cst_18 = arith.constant dense<0xFF800000> : vector<8x8xf32>
    %27 = vector.multi_reduction <maximumf>, %26, %cst_18 [1] : vector<8x8x8xf32> to vector<8x8xf32>
    %28 = tpu.iota {dimensions = array<i32: 1>} : vector<8x8xi32>
    %c0_19 = arith.constant 0 : index
    %c0_20 = arith.constant 0 : index
    %29 = vector.load %arg2[%c0_19, %c0_20] : memref<8x1xi32, #tpu.memory_space<vmem>>, vector<8x1xi32>
    %30 = vector.broadcast %29 : vector<8x1xi32> to vector<8x8xi32>
    %31 = arith.cmpi slt, %28, %30 : vector<8x8xi32>
    %cst_21 = arith.constant 0xCA800000 : f32
    %32 = vector.broadcast %cst_21 : f32 to vector<8x8xf32>
    %33 = arith.select %31, %27, %32 : vector<8x8xi1>, vector<8x8xf32>
    %cst_22 = arith.constant dense<0xFF800000> : vector<8xf32>
    %34 = vector.multi_reduction <maximumf>, %33, %cst_22 [1] : vector<8x8xf32> to vector<8xf32>
    %35 = vector.shape_cast %34 : vector<8xf32> to vector<8x1xf32>
    %36 = vector.broadcast %35 : vector<8x1xf32> to vector<8x8xf32>
    %37 = arith.subf %33, %36 : vector<8x8xf32>
    %38 = math.exp %37 : vector<8x8xf32>
    %cst_23 = arith.constant dense<0.000000e+00> : vector<8xf32>
    %39 = vector.multi_reduction <add>, %38, %cst_23 [1] : vector<8x8xf32> to vector<8xf32>
    %40 = vector.shape_cast %39 : vector<8xf32> to vector<8x1xf32>
    %41 = tpu.reciprocal %40 {approx = true} : vector<8x1xf32> -> vector<8x1xf32>
    %42 = vector.broadcast %41 : vector<8x1xf32> to vector<8x8xf32>
    %43 = arith.mulf %38, %42 : vector<8x8xf32>
    %44 = vector.shape_cast %43 : vector<8x8xf32> to vector<8x8x1xf32>
    %45 = vector.broadcast %44 : vector<8x8x1xf32> to vector<8x8x32xf32>
    %46 = arith.mulf %45, %2 : vector<8x8x32xf32>
    %cst_24 = arith.constant dense<0.000000e+00> : vector<8x32xf32>
    %47 = vector.multi_reduction <add>, %46, %cst_24 [1] : vector<8x8x32xf32> to vector<8x32xf32>
    %cst_25 = arith.constant 0.000000e+00 : f32
    %48 = vector.broadcast %cst_25 : f32 to vector<8x120xf32>
    %49 = tpu.concatenate %33, %48 in 1 : vector<8x8xf32>, vector<8x120xf32> -> vector<8x128xf32>
    %c0_26 = arith.constant 0 : index
    %c0_27 = arith.constant 0 : index
    %50 = vector.load %arg10[%c0_26, %c0_27] : memref<8x128xf32, #tpu.memory_space<vmem>>, vector<8x128xf32>
    tpu.vector_store %arg10[%c0_26, %c0_27], %49 {strides = array<i32>} : memref<8x128xf32, #tpu.memory_space<vmem>>, vector<8x128xf32>,
    %cst_28 = arith.constant 0.000000e+00 : f32
    %51 = vector.broadcast %cst_28 : f32 to vector<8x96xf32>
    %52 = tpu.concatenate %47, %51 in 1 : vector<8x32xf32>, vector<8x96xf32> -> vector<8x128xf32>
    %c0_29 = arith.constant 0 : index
    %c0_30 = arith.constant 0 : index
    %53 = vector.load %arg9[%c0_29, %c0_30] : memref<8x128xf32, #tpu.memory_space<vmem>>, vector<8x128xf32>
    tpu.vector_store %arg9[%c0_29, %c0_30], %52 {strides = array<i32>} : memref<8x128xf32, #tpu.memory_space<vmem>>, vector<8x128xf32>,
    return
  }
  func.func @transform_0(%arg0: i32) -> (i32, i32) {
    %c0_i32 = arith.constant 0 : i32
    %c0_i32_0 = arith.constant 0 : i32
    return %arg0, %c0_i32 : i32, i32
  }
  func.func @transform_1(%arg0: i32) -> (i32, i32) {
    %c0_i32 = arith.constant 0 : i32
    %c0_i32_0 = arith.constant 0 : i32
    return %arg0, %c0_i32 : i32, i32
  }
  func.func @transform_2(%arg0: i32) -> (i32, i32) {
    %c0_i32 = arith.constant 0 : i32
    %c0_i32_0 = arith.constant 0 : i32
    return %arg0, %c0_i32 : i32, i32
  }
  func.func @transform_3(%arg0: i32) -> (i32, i32, i32) {
    %c0_i32 = arith.constant 0 : i32
    %c0_i32_0 = arith.constant 0 : i32
    %c0_i32_1 = arith.constant 0 : i32
    return %arg0, %c0_i32, %c0_i32_0 : i32, i32, i32
  }
  func.func @transform_4(%arg0: i32) -> (i32, i32, i32) {
    %c0_i32 = arith.constant 0 : i32
    %c0_i32_0 = arith.constant 0 : i32
    %c0_i32_1 = arith.constant 0 : i32
    return %arg0, %c0_i32, %c0_i32_0 : i32, i32, i32
  }
  func.func @transform_5(%arg0: i32) -> (i32, i32) {
    %c0_i32 = arith.constant 0 : i32
    %c0_i32_0 = arith.constant 0 : i32
    %c0_i32_1 = arith.constant 0 : i32
    return %c0_i32, %c0_i32_0 : i32, i32
  }
  func.func @transform_6(%arg0: i32) -> (i32, i32) {
    %c0_i32 = arith.constant 0 : i32
    %c0_i32_0 = arith.constant 0 : i32
    %c0_i32_1 = arith.constant 0 : i32
    return %c0_i32, %c0_i32_0 : i32, i32
  }
  func.func @transform_7(%arg0: i32) -> (i32, i32) {
    %c0_i32 = arith.constant 0 : i32
    %c0_i32_0 = arith.constant 0 : i32
    %c0_i32_1 = arith.constant 0 : i32
    return %c0_i32, %c0_i32_0 : i32, i32
  }
  func.func @transform_8(%arg0: i32) -> (i32, i32) {
    %c0_i32 = arith.constant 0 : i32
    %c0_i32_0 = arith.constant 0 : i32
    return %arg0, %c0_i32 : i32, i32
  }
  func.func @transform_9(%arg0: i32) -> (i32, i32) {
    %c0_i32 = arith.constant 0 : i32
    %c0_i32_0 = arith.constant 0 : i32
    return %arg0, %c0_i32 : i32, i32
  }
}

</mosaic_0001>

<bundles_post_ra>
// kernel: coatt_forward.1
= control target key start
LH: loop header
LB: loop body
LE: loop exit
PB: predicated region body
PF: predicated region fallthrough
CT: control target
= control target key end

     0   :  { %v1193_v0 = vmov 0.0   ;;  %vm1194_vm0 = vmmov 0   ;;  %vm85_vm1 = vcmask 261120   ;;  %v1195_v25 = vmov 1966171168   ;;  %s1502_s5 = inlined_call_operand.vmem [shape: bf16[32,32], index: 5, kind: input, shape index: {}]   ;;  %s1503_s6 = inlined_call_operand.vmem [shape: bf16[32,32], index: 6, kind: input, shape index: {}]   ;;  %s1504_s2 = inlined_call_operand.vmem [shape: f32[8,32], index: 2, kind: input, shape index: {}]   ;;  %s1505_s3 = inlined_call_operand.vmem [shape: f32[8,8,32], index: 3, kind: input, shape index: {}]   ;;  %s1506_s4 = inlined_call_operand.vmem [shape: f32[8,8,32], index: 4, kind: input, shape index: {}]   ;;  %s1507_s0 = inlined_call_operand.vmem [shape: s32[8,1], index: 0, kind: input, shape index: {}]   ;;  %s1508_s1 = inlined_call_operand.vmem [shape: s32[8,1], index: 1, kind: input, shape index: {}]   ;;  %s1509_s7 = inlined_call_operand.vmem [shape: f32[1,32], index: 7, kind: input, shape index: {}]   ;;  %s1510_s9 = inlined_call_operand.vmem [shape: f32[8,128], index: 9, kind: output, shape index: {1}]   ;;  %s1511_s8 = inlined_call_operand.vmem [shape: f32[8,128], index: 8, kind: output, shape index: {0}]  }
   0x1   :  { %1110 = vmatprep.subr.bf16.mxu0 %v1193_v0  ;;  %v1184_v1 = vld [vmem:[%s1502_s5 + $0x8] sm:$0xff]   ;;  %1114 = vmatprep.mubr.msk.bf16.mxu0 %vm1194_vm0, %v1193_v0  ;;  %v1186_v3 = vld [vmem:[%s1502_s5] sm:$0xff]   ;;  %v35_v10 = vld [vmem:[%s1505_s3 + $0x10] sm:$0xff]  ;;  %v225_v26 = vunpack.c.l.s4 %v1195_v25  ;;  %v227_v27 = vlaneseq  ;;  %v1196_v31 = vmov 0   ;;  %vm820_vm4 = vcmask 64512  }
   0x2   :  { %v1185_v2 = vld [vmem:[%s1503_s6 + $0x8] sm:$0xff]   ;;  %1111 = vmatpush3.bf16.msra.mxu0 %v1184_v1  ;;  %v1187_v4 = vld [vmem:[%s1503_s6] sm:$0xff]   ;;  %v36_v11 = vld [vmem:[%s1505_s3 + $0x18] sm:$0xff]  ;;  %1182 = vset.pattern.permute.xlu0 %v1196_v31  ;;  %vm892_vm10 = vcmask 1041409   ;;  %vm894_vm12 = vcmask 1042434   ;;  %vm896_vm13 = vcmask 1043459  }
   0x3   :  { %1118 = vmatprep.subr.bf16.mxu1 %v1185_v2  ;;  %1112 = vmatprep.subr.bf16.mxu0 %v1193_v0  ;;  %v32_v5 = vld [vmem:[%s1504_s2] sm:$0xff]  ;;  %v34_v7 = vld [vmem:[%s1505_s3 + $0x8] sm:$0xff]  ;;  %v130_v14 = vpack.c.bf16 %v36_v11, %v35_v10  ;;  %v39_v16 = vld [vmem:[%s1505_s3 + $0x30] sm:$0xff]  ;;  %v226_v28 = vunpack.c.0.s8 %v225_v26  ;;  %v1320_v29 = vshrl.u32 %v227_v27, 7  ;;  %vm898_vm14 = vcmask 1044484  }
   0x4   :  { %1119 = vmatpush3.bf16.msra.mxu1 %v1185_v2  ;;  %v33_v6 = vld [vmem:[%s1505_s3] sm:$0xff]  ;;  %v65_v8 = vpack.c.bf16 %v32_v5, %v32_v5  ;;  %v38_v13 = vld [vmem:[%s1505_s3 + $0x28] sm:$0xff]  ;;  %v40_v17 = vld [vmem:[%s1505_s3 + $0x38] sm:$0xff]  ;;  %1183 = vset.pattern.permute.xlu1 %v1196_v31  ;;  %vm900_vm15 = vcmask 1045509  }
   0x5   :  { %1120 = vmatprep.subr.bf16.mxu1 %v1187_v4  ;;  %v129_v9 = vpack.c.bf16 %v34_v7, %v33_v6  ;;  %v37_v12 = vld [vmem:[%s1505_s3 + $0x20] sm:$0xff]  ;;  %v132_v18 = vpack.c.bf16 %v40_v17, %v39_v16  ;;  %v1311_v21 = vld [vmem:[%s1506_s4 + $0x10] sm:$0xff]  ;;  %v1323_v30 = vsub.s32 %v226_v28, %v1320_v29  ;;  %v1330_v35 = vsub.s32 0, %v1320_v29  ;;  %v1355_v2 = vld [vmem:[%s1506_s4 + $0x8] sm:$0xff] }
   0x6   :  { %1113 = vmatpush3.bf16.msra.mxu0 %v1186_v3  ;;  %v131_v15 = vpack.c.bf16 %v38_v13, %v37_v12  ;;  %v1304_v19 = vld [vmem:[%s1506_s4] sm:$0xff]  ;;  %v51_v23 = vpack.c.bf16 %v1311_v21, %v1311_v21  ;;  %v50_v12 = vpack.c.bf16 %v1355_v2, %v1355_v2  ;;  %v1377_v25 = vld [vmem:[%s1506_s4 + $0x18] sm:$0xff] }
   0x7   :  { %1122 = vmatprep.mubr.msk.bf16.mxu1 %vm85_vm1, %v129_v9  ;;  %1130 = vmatprep.subr.bf16.mxu0 %v1193_v0  ;;  %v49_v20 = vpack.c.bf16 %v1304_v19, %v1304_v19  ;;  %v698_v32 = vld [vmem:[%s1507_s0] sm:$0xff] }
   0x8   :  { %1121 = vmatpush3.bf16.msra.mxu1 %v1187_v4  ;;  %v424_v24 = vsel %vm85_vm1, %v51_v23, 0  ;;  %v706_v33 = vrot.slane %v698_v32, %v1323_v30  ;;  %v699_v34 = vcombine.high %v698_v32, %v698_v32  ;;  %v879_v55 = vld [vmem:[%s1508_s1] sm:$0xff] }
   0x9   :  { %1115 = vmatmul.mubr.msk.bf16.vlgmr.msra.gmra.mxu0 %vm85_vm1, %v65_v8  ;;  %1142 = vmatprep.subr.bf16.mxu1 %v1193_v0  ;;  %v332_v22 = vsel %vm85_vm1, %v49_v20, 0  ;;  %v1067_v56 = vld [vmem:[%s1509_s7] ss:$0 sm:$0xff] }
   0xa   :  { %1132 = vmatprep.mubr.msk.bf16.mxu0 %vm1194_vm0, %v1193_v0  ;;  %1131 = vmatpush3.bf16.xpose.msra.mxu0 %v332_v22  ;;  %v722_v36 = vrot.slane %v706_v33, %v1323_v30  ;;  %v714_v37 = vcombine.high %v706_v33, %v706_v33  ;;  %v713_v38 = vrot.slane %v699_v34, %v1323_v30  ;;  %v1362_v8 = vld [vmem:[%s1506_s4 + $0x20] sm:$0xff]  ;;  %v1387_v33 = vld [vmem:[%s1506_s4 + $0x30] sm:$0xff] }
   0xb   :  { %1123 = vmatmul.mubr.msk.bf16.vlgmr.msra.gmra.mxu1 %vm85_vm1, %v130_v14  ;;  %1136 = vmatprep.subr.bf16.mxu0 %v1193_v0  ;;  %v53_v17 = vpack.c.bf16 %v1362_v8, %v1362_v8 }
   0xc   :  { %1126 = vmatprep.mubr.msk.bf16.mxu1 %vm85_vm1, %v131_v15  ;;  %1143 = vmatpush3.bf16.xpose.msra.mxu1 %v424_v24  ;;  %v751_v39 = vrot.slane %v722_v36, %v1330_v35  ;;  %v744_v40 = vcombine.high %v722_v36, %v722_v36  ;;  %v736_v41 = vrot.slane %v714_v37, %v1323_v30  ;;  %v378_v24 = vsel %vm85_vm1, %v50_v12, 0 }
   0xd   :  { %1154 = vmatprep.subr.bf16.mxu1 %v1193_v0  ;;  %v715_v42 = vcombine.high %v713_v38, %v713_v38  ;;  %v729_v45 = vrot.slane %v713_v38, %v1323_v30  ;;  %v516_v31 = vsel %vm85_vm1, %v53_v17, 0  ;;  %v52_v37 = vpack.c.bf16 %v1377_v25, %v1377_v25 }
   0xe   :  { %781 = vperm.xlu0 %1182, %v751_v39   ;;  %v759_v43 = vrot.slane %v744_v40, %v1330_v35  ;;  %v755_v44 = vrot.slane %v736_v41, %v1330_v35  ;;  %v746_v47 = vcombine.high %v736_v41, %v736_v41  ;;  %v55_v40 = vpack.c.bf16 %v1387_v33, %v1387_v33 }
   0xf   :  { %v743_v46 = vrot.slane %v715_v42, %v1323_v30  ;;  %v767_v49 = vrot.slane %v729_v45, %v1330_v35  ;;  %v745_v50 = vcombine.high %v729_v45, %v729_v45 }
  0x10   :  { %787 = vperm.xlu1 %1183, %v759_v43   ;;  %v763_v51 = vrot.slane %v746_v47, %v1330_v35  ;;  %v470_v43 = vsel %vm85_vm1, %v52_v37, 0 }
  0x11   :  { %v771_v48 = vrot.slane %v743_v46, %v1330_v35  ;;  %v747_v52 = vcombine.high %v743_v46, %v743_v46  ;;  %v775_v53 = vrot.slane %v745_v50, %v1330_v35 }
  0x12   :  { %784 = vperm.xlu0 %1182, %v755_v44   ;;  %v1403_v44 = vld [vmem:[%s1506_s4 + $0x28] sm:$0xff] }
  0x13   :  { %1127 = vmatmul.mubr.msk.bf16.gmra.mxu1 %vm85_vm1, %v132_v18  ;;  %v779_v54 = vrot.slane %v747_v52, %v1330_v35  ;;  %v54_v50 = vpack.c.bf16 %v1403_v44, %v1403_v44 }
  0x14   :  { %1144 = vmatprep.mubr.msk.bf16.mxu1 %vm1194_vm0, %v1193_v0  ;;  %796 = vperm.xlu1 %1183, %v771_v48   ;;  %v608_v48 = vsel %vm85_vm1, %v55_v40, 0 }
  0x16   :  { %793 = vperm.xlu0 %1182, %v767_v49  }
  0x18   :  { %790 = vperm.xlu1 %1183, %v763_v51  }
  0x1a   :  { %799 = vperm.xlu0 %1182, %v775_v53  }
  0x1c   :  { %802 = vperm.xlu1 %1183, %v779_v54  }
  0x1e   :  { %881 = vperm.xlu0 %1182, %v879_v55   ;;  %v562_v55 = vsel %vm85_vm1, %v54_v50, 0 }
  0xc9   :  { %v123_v57 = vpop.f32.mrf.mxu0 }
  0xca   :  { %v124_v58 = vadd.f32 %v1067_v56, %v123_v57  ;;  %v1421_v57 = vld [vmem:[%s1506_s4 + $0x38] sm:$0xff] }
  0xcb   :  { %v1124_v59 = vpop.f32.mrf.mxu1  ;;  %v1116_v60 = vpop.f32.mrf.mxu0 }
  0xcc   :  { %v223_v61 = vcombine.high %v124_v58, %v124_v58  ;;  %v230_v62 = vrot.slane %v124_v58, %v1323_v30 }
  0xcd   :  { %v191_v63 = vpop.f32.mrf.mxu1  ;;  %v126_v1 = vpop.f32.mrf.mxu0 }
  0xce   :  { %v237_v3 = vrot.slane %v223_v61, %v1323_v30  ;;  %v238_v4 = vcombine.high %v230_v62, %v230_v62  ;;  %v246_v5 = vrot.slane %v230_v62, %v1323_v30  ;;  %v56_v61 = vpack.c.bf16 %v1421_v57, %v1421_v57 }
  0xcf   :  { %v1125_v6 = vpop.f32.mrf.mxu1  ;;  %v1117_v7 = vpop.f32.mrf.mxu0 }
  0xd0   :  { %v268_v9 = vcombine.high %v246_v5, %v246_v5  ;;  %v275_v10 = vrot.slane %v246_v5, %v1330_v35  ;;  %v260_v11 = vrot.slane %v238_v4, %v1323_v30  ;;  %v253_v16 = vrot.slane %v237_v3, %v1323_v30  ;;  %v782_v5 = vpop.permute.xlu0 %781  ;;  %v788_v7 = vpop.permute.xlu1 %787 }
  0xd1   :  { %v194_v13 = vpop.f32.mrf.mxu1  ;;  %v239_v45 = vcombine.high %v237_v3, %v237_v3  ;;  %v654_v1 = vsel %vm85_vm1, %v56_v61, 0  ;;  %vm804_vm2 = vcmp.lt.s32.totalorder %v1320_v29, %v782_v5  ;;  %vm806_vm5 = vcmp.lt.s32.totalorder %v1320_v29, %v788_v7 }
  0xd2   :  { %v283_v14 = vrot.slane %v268_v9, %v1330_v35  ;;  %v312_v15 = vadd.f32 %v275_v10, %v191_v63  ;;  %v279_v23 = vrot.slane %v260_v11, %v1330_v35  ;;  %v291_v28 = vrot.slane %v253_v16, %v1330_v35 }
  0xd3   :  { %v1128_v18 = vpop.f32.mrf.mxu1  ;;  %v270_v34 = vcombine.high %v260_v11, %v260_v11  ;;  %v269_v38 = vcombine.high %v253_v16, %v253_v16  ;;  %v267_v53 = vrot.slane %v239_v45, %v1323_v30 }
  0xd4   :  { %v314_v20 = vadd.f32 %v1124_v59, %v283_v14  ;;  %v320_v22 = vpack.c.bf16 %v312_v15, %v312_v15  ;;  %v313_v36 = vadd.f32 %v279_v23, %v194_v13  ;;  %v785_v9 = vpop.permute.xlu0 %784  ;;  %v797_v14 = vpop.permute.xlu1 %796 }
  0xd5   :  { %v207_v32 = vpop.f32.mrf.mxu1  ;;  %v287_v41 = vrot.slane %v270_v34, %v1330_v35  ;;  %v299_v46 = vrot.slane %v269_v38, %v1330_v35  ;;  %v295_v59 = vrot.slane %v267_v53, %v1330_v35  ;;  %v271_v60 = vcombine.high %v267_v53, %v267_v53 }
  0xd6   :  { %v322_v26 = vpack.c.bf16 %v314_v20, %v314_v20  ;;  %1133 = vmatmul.mubr.msk.bf16.vlgmr.msra.gmra.mxu0 %vm85_vm1, %v320_v22  ;;  %v316_v39 = vadd.f32 %v291_v28, %v207_v32  ;;  %v321_v42 = vpack.c.bf16 %v313_v36, %v313_v36  ;;  %vm805_vm3 = vcmp.lt.s32.totalorder %v1320_v29, %v785_v9 }
  0xd7   :  { %1137 = vmatpush3.bf16.xpose.msra.mxu0 %v378_v24  ;;  %1138 = vmatprep.mubr.msk.bf16.mxu0 %vm1194_vm0, %v1193_v0  ;;  %v315_v49 = vadd.f32 %v1125_v6, %v287_v41  ;;  %v1129_v51 = vpop.f32.mrf.mxu1  ;;  %v318_v52 = vadd.f32 %v1128_v18, %v299_v46  ;;  %v303_v62 = vrot.slane %v271_v60, %v1330_v35 }
  0xd8   :  { %1145 = vmatmul.mubr.msk.bf16.vlgmr.msra.gmra.mxu1 %vm85_vm1, %v322_v26  ;;  %1148 = vmatprep.subr.bf16.mxu0 %v1193_v0  ;;  %v324_v47 = vpack.c.bf16 %v316_v39, %v316_v39  ;;  %v794_v17 = vpop.permute.xlu0 %793  ;;  %v791_v34 = vpop.permute.xlu1 %790  ;;  %vm809_vm9 = vcmp.lt.s32.totalorder %v1320_v29, %v797_v14 }
  0xd9   :  { %1155 = vmatpush3.bf16.xpose.msra.mxu1 %v516_v31  ;;  %1156 = vmatprep.mubr.msk.bf16.mxu1 %vm1194_vm0, %v1193_v0  ;;  %v323_v54 = vpack.c.bf16 %v315_v49, %v315_v49  ;;  %v210_v56 = vpop.f32.mrf.mxu1  ;;  %v326_v58 = vpack.c.bf16 %v318_v52, %v318_v52  ;;  %v319_v3 = vadd.f32 %v1129_v51, %v303_v62 }
  0xda   :  { %1166 = vmatprep.subr.bf16.mxu1 %v1193_v0  ;;  %v317_v30 = vadd.f32 %v295_v59, %v210_v56  ;;  %vm808_vm6 = vcmp.lt.s32.totalorder %v1320_v29, %v794_v17  ;;  %vm807_vm7 = vcmp.lt.s32.totalorder %v1320_v29, %v791_v34 }
  0xdb   :  { %v327_v4 = vpack.c.bf16 %v319_v3, %v319_v3 }
  0xdc   :  { %v325_v63 = vpack.c.bf16 %v317_v30, %v317_v30  ;;  %v800_v45 = vpop.permute.xlu0 %799 }
  0xdd   :  { %vm810_vm8 = vcmp.lt.s32.totalorder %v1320_v29, %v800_v45 }
  0xde   :  { %1139 = vmatmul.mubr.msk.bf16.vlgmr.msra.gmra.mxu0 %vm85_vm1, %v321_v42 }
  0xdf   :  { %1149 = vmatpush3.bf16.xpose.msra.mxu0 %v470_v43  ;;  %1150 = vmatprep.mubr.msk.bf16.mxu0 %vm1194_vm0, %v1193_v0 }
  0xe0   :  { %1157 = vmatmul.mubr.msk.bf16.vlgmr.msra.gmra.mxu1 %vm85_vm1, %v324_v47  ;;  %1160 = vmatprep.subr.bf16.mxu0 %v1193_v0 }
  0xe1   :  { %1167 = vmatpush3.bf16.xpose.msra.mxu1 %v608_v48  ;;  %1168 = vmatprep.mubr.msk.bf16.mxu1 %vm1194_vm0, %v1193_v0 }
  0xe6   :  { %1151 = vmatmul.mubr.msk.bf16.vlgmr.msra.gmra.mxu0 %vm85_vm1, %v323_v54 }
  0xe7   :  { %1161 = vmatpush3.bf16.xpose.msra.mxu0 %v562_v55  ;;  %1162 = vmatprep.mubr.msk.bf16.mxu0 %vm1194_vm0, %v1193_v0 }
  0xe8   :  { %1169 = vmatmul.mubr.msk.bf16.vlgmr.msra.gmra.mxu1 %vm85_vm1, %v326_v58  ;;  %1172 = vmatprep.subr.bf16.mxu0 %v1193_v0 }
  0xee   :  { %1163 = vmatmul.mubr.msk.bf16.vlgmr.msra.gmra.mxu0 %vm85_vm1, %v325_v63 }
  0xef   :  { %1173 = vmatpush3.bf16.xpose.msra.mxu0 %v654_v1  ;;  %1174 = vmatprep.mubr.msk.bf16.mxu0 %vm1194_vm0, %v1193_v0  ;;  %vm902_vm0 = vcmask 1046534  }
  0xf6   :  { %1175 = vmatmul.mubr.msk.bf16.vlgmr.msra.gmra.mxu0 %vm85_vm1, %v327_v4 }
 0x196   :  { %v368_v6 = vpop.f32.mrf.mxu0 }
 0x197   :  { %v812_v0 = vsel %vm804_vm2, %v368_v6, -4194304.0  ;;  %vm904_vm2 = vcmask 1047559  }
 0x198   :  { %v1134_v10 = vpop.f32.mrf.mxu0  ;;  %v460_v11 = vpop.f32.mrf.mxu1  ;;  %v821_v23 = vsel %vm820_vm4, %v812_v0, -inf }
 0x199   :  { %v814_v24 = vsel %vm806_vm5, %v460_v11, -4194304.0  ;;  %v822_v38 = vrot.slane %v821_v23, 4 }
 0x19a   :  { %v371_v12 = vpop.f32.mrf.mxu0  ;;  %v1146_v13 = vpop.f32.mrf.mxu1  ;;  %v835_v39 = vsel %vm820_vm4, %v814_v24, -inf }
 0x19b   :  { %v836_v46 = vrot.slane %v835_v39, 4  ;;  %v823_v49 = vmax.f32 %v821_v23, %v822_v38 }
 0x19c   :  { %v1135_v15 = vpop.f32.mrf.mxu0  ;;  %v463_v16 = vpop.f32.mrf.mxu1 }
 0x19d   :  { %v837_v59 = vmax.f32 %v835_v39, %v836_v46  ;;  %v824_v62 = vrot.slane %v823_v49, 2 }
 0x19e   :  { %v414_v18 = vpop.f32.mrf.mxu0  ;;  %v1147_v20 = vpop.f32.mrf.mxu1 }
 0x19f   :  { %v813_v22 = vsel %vm805_vm3, %v414_v18, -4194304.0  ;;  %v838_v7 = vrot.slane %v837_v59, 2  ;;  %v825_v13 = vmax.f32 %v823_v49, %v824_v62 }
 0x1a0   :  { %v828_v26 = vsel %vm820_vm4, %v813_v22, -inf  ;;  %v1140_v28 = vpop.f32.mrf.mxu0  ;;  %v552_v31 = vpop.f32.mrf.mxu1 }
 0x1a1   :  { %v829_v32 = vrot.slane %v828_v26, 4  ;;  %v816_v40 = vsel %vm808_vm6, %v552_v31, -4194304.0  ;;  %v839_v22 = vmax.f32 %v837_v59, %v838_v7  ;;  %v826_v28 = vrot.slane %v825_v13, 1  ;;  %v803_v31 = vpop.permute.xlu1 %802 }
 0x1a2   :  { %v417_v36 = vpop.f32.mrf.mxu0  ;;  %v1158_v37 = vpop.f32.mrf.mxu1  ;;  %v849_v50 = vsel %vm820_vm4, %v816_v40, -inf  ;;  %vm811_vm11 = vcmp.lt.s32.totalorder %v1320_v29, %v803_v31 }
 0x1a3   :  { %v830_v43 = vmax.f32 %v828_v26, %v829_v32  ;;  %v850_v60 = vrot.slane %v849_v50, 4  ;;  %v840_v38 = vrot.slane %v839_v22, 1 }
 0x1a4   :  { %v1141_v41 = vpop.f32.mrf.mxu0  ;;  %v555_v42 = vpop.f32.mrf.mxu1 }
 0x1a5   :  { %v831_v55 = vrot.slane %v830_v43, 2  ;;  %v851_v9 = vmax.f32 %v849_v50, %v850_v60  ;;  %v827_v42 = vmax.f32 %v825_v13, %v826_v28 }
 0x1a6   :  { %v506_v47 = vpop.f32.mrf.mxu0  ;;  %v1159_v48 = vpop.f32.mrf.mxu1 }
 0x1a7   :  { %v815_v51 = vsel %vm807_vm7, %v506_v47, -4194304.0  ;;  %v832_v5 = vmax.f32 %v830_v43, %v831_v55  ;;  %v852_v23 = vrot.slane %v851_v9, 2 }
 0x1a8   :  { %v842_v52 = vsel %vm820_vm4, %v815_v51, -inf  ;;  %v1152_v53 = vpop.f32.mrf.mxu0  ;;  %v644_v54 = vpop.f32.mrf.mxu1 }
 0x1a9   :  { %v843_v56 = vrot.slane %v842_v52, 4  ;;  %v818_v58 = vsel %vm810_vm8, %v644_v54, -4194304.0  ;;  %v833_v17 = vrot.slane %v832_v5, 1  ;;  %v853_v39 = vmax.f32 %v851_v9, %v852_v23  ;;  %v882_v9 = vpop.permute.xlu0 %881 }
 0x1aa   :  { %v509_v30 = vpop.f32.mrf.mxu0  ;;  %v1170_v61 = vpop.f32.mrf.mxu1  ;;  %v863_v1 = vsel %vm820_vm4, %v818_v58, -inf  ;;  %v928_v23 = vsub.s32 1, %v1320_v29 }
 0x1ab   :  { %v844_v63 = vmax.f32 %v842_v52, %v843_v56  ;;  %v864_v10 = vrot.slane %v863_v1, 4  ;;  %v834_v14 = vmax.f32 %v832_v5, %v833_v17  ;;  %v841_v52 = vmax.f32 %v839_v22, %v840_v38 }
 0x1ac   :  { %v1153_v3 = vpop.f32.mrf.mxu0  ;;  %v647_v4 = vpop.f32.mrf.mxu1  ;;  %v854_v53 = vrot.slane %v853_v39, 1  ;;  %v956_v38 = vsub.s32 5, %v1320_v29 }
 0x1ad   :  { %v845_v6 = vrot.slane %v844_v63, 2  ;;  %v865_v24 = vmax.f32 %v863_v1, %v864_v10  ;;  %v893_v48 = vsel %vm892_vm10, %v834_v14, %v827_v42  ;;  %v878_v4 = vand.u32 127, %v227_v27 }
 0x1ae   :  { %v598_v11 = vpop.f32.mrf.mxu0  ;;  %v1171_v12 = vpop.f32.mrf.mxu1  ;;  %v895_v58 = vsel %vm894_vm12, %v841_v52, %v893_v48  ;;  %v855_v62 = vmax.f32 %v853_v39, %v854_v53 }
 0x1af   :  { %v817_v15 = vsel %vm809_vm9, %v598_v11, -4194304.0  ;;  %v846_v18 = vmax.f32 %v844_v63, %v845_v6  ;;  %v866_v40 = vrot.slane %v865_v24, 2  ;;  %vm883_vm3 = vcmp.lt.s32.totalorder %v878_v4, %v882_v9 }
 0x1b0   :  { %v856_v16 = vsel %vm820_vm4, %v817_v15, -inf  ;;  %v1164_v0 = vpop.f32.mrf.mxu0 }
 0x1b1   :  { %v857_v20 = vrot.slane %v856_v16, 4  ;;  %v847_v36 = vrot.slane %v846_v18, 1  ;;  %v867_v54 = vmax.f32 %v865_v24, %v866_v40 }
 0x1b2   :  { %v601_v26 = vpop.f32.mrf.mxu0 }
 0x1b3   :  { %v858_v32 = vmax.f32 %v856_v16, %v857_v20  ;;  %v848_v49 = vmax.f32 %v846_v18, %v847_v36  ;;  %v868_v63 = vrot.slane %v867_v54, 1 }
 0x1b4   :  { %v1165_v34 = vpop.f32.mrf.mxu0 }
 0x1b5   :  { %v859_v37 = vrot.slane %v858_v32, 2  ;;  %v897_v60 = vsel %vm896_vm13, %v848_v49, %v895_v58  ;;  %v869_v7 = vmax.f32 %v867_v54, %v868_v63  ;;  %v942_v34 = vsub.s32 3, %v1320_v29 }
 0x1b6   :  { %v690_v41 = vpop.f32.mrf.mxu0  ;;  %v899_v3 = vsel %vm898_vm14, %v855_v62, %v897_v60 }
 0x1b7   :  { %v860_v43 = vmax.f32 %v858_v32, %v859_v37  ;;  %v819_v45 = vsel %vm811_vm11, %v690_v41, -4194304.0  ;;  %v935_v32 = vsub.s32 2, %v1320_v29  ;;  %v949_v37 = vsub.s32 4, %v1320_v29 }
 0x1b8   :  { %v870_v46 = vsel %vm820_vm4, %v819_v45, -inf  ;;  %v1176_v47 = vpop.f32.mrf.mxu0  ;;  %v963_v41 = vsub.s32 6, %v1320_v29 }
 0x1b9   :  { %v861_v50 = vrot.slane %v860_v43, 1  ;;  %v871_v51 = vrot.slane %v870_v46, 4 }
 0x1ba   :  { %v693_v55 = vpop.f32.mrf.mxu0 }
 0x1bb   :  { %v872_v56 = vmax.f32 %v870_v46, %v871_v51  ;;  %v862_v30 = vmax.f32 %v860_v43, %v861_v50 }
 0x1bc   :  { %v1177_v59 = vpop.f32.mrf.mxu0 }
 0x1bd   :  { %v873_v61 = vrot.slane %v872_v56, 2  ;;  %v901_v6 = vsel %vm900_vm15, %v862_v30, %v899_v3 }
 0x1be   :  { %v903_v11 = vsel %vm902_vm0, %v869_v7, %v901_v6 }
 0x1bf   :  { %v874_v1 = vmax.f32 %v872_v56, %v873_v61 }
 0x1c1   :  { %v875_v5 = vrot.slane %v874_v1, 1 }
 0x1c3   :  { %v876_v10 = vmax.f32 %v874_v1, %v875_v5 }
 0x1c5   :  { %v905_v12 = vsel %vm904_vm2, %v876_v10, %v903_v11 }
 0x1c6   :  { %v907_v13 = vsel %vm883_vm3, %v905_v12, -4194304.0 }
 0x1c7   :  { %v908_v15 = vsel %vm820_vm4, %v907_v13, -inf  ;;  %v1039_v16 = vsel %vm820_vm4, %v907_v13, 0.0 }
 0x1c8   :  { %1040 = vst [vmem:[%s1510_s9] sm:$0xff] %v1039_v16  ;;  %909 = vmax.xlane.f32.xlu1 %v908_v15 }
 0x251   :  { %v910_v27 = vpop.xlane.xlu1 %909 }
 0x252   :  { %v911_v0 = vsub.f32 %v907_v13, %v910_v27 }
 0x254   :  { %v912_v17 = vmul.f32 1.442695, %v911_v0 }
 0x256   :  { %1189 = vpow2.f32 %v912_v17 }
 0x263   :  { %v1190_v18 = vpop.eup %1189 }
 0x264   :  { %v914_v20 = vsel %vm820_vm4, %v1190_v18, 0.0 }
 0x265   :  { %915 = vadd.xlane.f32.xlu0 %v914_v20 }
 0x2ee   :  { %v916_v22 = vpop.xlane.xlu0 %915 }
 0x2ef   :  { %1191 = vrcp.f32 %v916_v22 }
 0x2fc   :  { %v1192_v24 = vpop.eup %1191 }
 0x2fd   :  { %v918_v26 = vmul.f32 %v1192_v24, %v1190_v18 }
 0x2ff   :  { %v929_v28 = vrot.slane %v918_v26, %v928_v23  ;;  %v922_v31 = vrot.slane %v918_v26, %v1330_v35  ;;  %v936_v14 = vrot.slane %v918_v26, %v935_v32  ;;  %v943_v36 = vrot.slane %v918_v26, %v942_v34 }
 0x300   :  { %v950_v39 = vrot.slane %v918_v26, %v949_v37  ;;  %v957_v40 = vrot.slane %v918_v26, %v956_v38  ;;  %v970_v35 = vsub.s32 7, %v1320_v29  ;;  %v964_v42 = vrot.slane %v918_v26, %v963_v41 }
 0x301   :  { %931 = vbcast.lane.b32.xlu1 %v929_v28, 256  ;;  %924 = vbcast.lane.b32.xlu0 %v922_v31, 256 }
 0x302   :  { %v971_v43 = vrot.slane %v918_v26, %v970_v35 }
 0x305   :  { %938 = vbcast.lane.b32.xlu1 %v936_v14, 256  ;;  %945 = vbcast.lane.b32.xlu0 %v943_v36, 256 }
 0x309   :  { %952 = vbcast.lane.b32.xlu1 %v950_v39, 256  ;;  %959 = vbcast.lane.b32.xlu0 %v957_v40, 256 }
 0x30d   :  { %966 = vbcast.lane.b32.xlu1 %v964_v42, 256  ;;  %973 = vbcast.lane.b32.xlu0 %v971_v43, 256 }
 0x373   :  { %v932_v45 = vpop.permute.xlu1 %931  ;;  %v925_v46 = vpop.permute.xlu0 %924 }
 0x374   :  { %v976_v47 = vmul.f32 %v932_v45, %v1355_v2  ;;  %v975_v48 = vmul.f32 %v925_v46, %v1304_v19 }
 0x376   :  { %v990_v49 = vsel %vm85_vm1, %v976_v47, 0.0  ;;  %v983_v50 = vsel %vm85_vm1, %v975_v48, 0.0 }
 0x377   :  { %v991_v51 = vrot.slane %v990_v49, 4  ;;  %v984_v52 = vrot.slane %v983_v50, 4  ;;  %v939_v53 = vpop.permute.xlu1 %938  ;;  %v946_v29 = vpop.permute.xlu0 %945 }
 0x378   :  { %v977_v54 = vmul.f32 %v939_v53, %v1311_v21  ;;  %v978_v55 = vmul.f32 %v946_v29, %v1377_v25 }
 0x379   :  { %v992_v56 = vadd.f32 %v991_v51, %v990_v49  ;;  %v985_v58 = vadd.f32 %v984_v52, %v983_v50 }
 0x37a   :  { %v997_v59 = vsel %vm85_vm1, %v977_v54, 0.0  ;;  %v1004_v2 = vsel %vm85_vm1, %v978_v55, 0.0 }
 0x37b   :  { %v993_v60 = vrot.slane %v992_v56, 2  ;;  %v986_v19 = vrot.slane %v985_v58, 2  ;;  %v998_v30 = vrot.slane %v997_v59, 4  ;;  %v1005_v61 = vrot.slane %v1004_v2, 4  ;;  %v953_v62 = vpop.permute.xlu1 %952  ;;  %v960_v63 = vpop.permute.xlu0 %959 }
 0x37c   :  { %v979_v1 = vmul.f32 %v953_v62, %v1362_v8  ;;  %v980_v3 = vmul.f32 %v960_v63, %v1403_v44 }
 0x37d   :  { %v994_v4 = vadd.f32 %v993_v60, %v992_v56  ;;  %v987_v21 = vadd.f32 %v986_v19, %v985_v58  ;;  %v999_v5 = vadd.f32 %v998_v30, %v997_v59  ;;  %v1006_v25 = vadd.f32 %v1005_v61, %v1004_v2 }
 0x37e   :  { %v1011_v6 = vsel %vm85_vm1, %v979_v1, 0.0  ;;  %v1018_v7 = vsel %vm85_vm1, %v980_v3, 0.0 }
 0x37f   :  { %v995_v9 = vrot.slane %v994_v4, 1  ;;  %v988_v10 = vrot.slane %v987_v21, 1  ;;  %v1000_v11 = vrot.slane %v999_v5, 2  ;;  %v1007_v12 = vrot.slane %v1006_v25, 2  ;;  %v967_v13 = vpop.permute.xlu1 %966  ;;  %v974_v15 = vpop.permute.xlu0 %973 }
 0x380   :  { %v1012_v16 = vrot.slane %v1011_v6, 4  ;;  %v1019_v27 = vrot.slane %v1018_v7, 4  ;;  %v981_v8 = vmul.f32 %v967_v13, %v1387_v33  ;;  %v982_v44 = vmul.f32 %v974_v15, %v1421_v57 }
 0x381   :  { %v996_v0 = vadd.f32 %v995_v9, %v994_v4  ;;  %v1001_v17 = vadd.f32 %v1000_v11, %v999_v5  ;;  %v1008_v18 = vadd.f32 %v1007_v12, %v1006_v25  ;;  %v989_v26 = vadd.f32 %v988_v10, %v987_v21 }
 0x382   :  { %v1013_v20 = vadd.f32 %v1012_v16, %v1011_v6  ;;  %v1020_v22 = vadd.f32 %v1019_v27, %v1018_v7  ;;  %v1025_v23 = vsel %vm85_vm1, %v981_v8, 0.0  ;;  %v1032_v24 = vsel %vm85_vm1, %v982_v44, 0.0 }
 0x383   :  { %v1002_v28 = vrot.slane %v1001_v17, 1  ;;  %v1009_v31 = vrot.slane %v1008_v18, 1  ;;  %v1026_v32 = vrot.slane %v1025_v23, 4  ;;  %v1033_v36 = vrot.slane %v1032_v24, 4 }
 0x384   :  { %v1014_v34 = vrot.slane %v1013_v20, 2  ;;  %v1021_v14 = vrot.slane %v1020_v22, 2  ;;  %v1049_v40 = vsel %vm892_vm10, %v996_v0, %v989_v26 }
 0x385   :  { %v1003_v37 = vadd.f32 %v1002_v28, %v1001_v17  ;;  %v1027_v33 = vadd.f32 %v1026_v32, %v1025_v23  ;;  %v1034_v39 = vadd.f32 %v1033_v36, %v1032_v24  ;;  %v1010_v41 = vadd.f32 %v1009_v31, %v1008_v18 }
 0x386   :  { %v1015_v38 = vadd.f32 %v1014_v34, %v1013_v20  ;;  %v1022_v57 = vadd.f32 %v1021_v14, %v1020_v22 }
 0x387   :  { %v1028_v35 = vrot.slane %v1027_v33, 2  ;;  %v1050_v42 = vsel %vm894_vm12, %v1003_v37, %v1049_v40  ;;  %v1035_v46 = vrot.slane %v1034_v39, 2 }
 0x388   :  { %v1016_v43 = vrot.slane %v1015_v38, 1  ;;  %v1023_v45 = vrot.slane %v1022_v57, 1  ;;  %v1051_v51 = vsel %vm896_vm13, %v1010_v41, %v1050_v42 }
 0x389   :  { %v1029_v47 = vadd.f32 %v1028_v35, %v1027_v33  ;;  %v1036_v50 = vadd.f32 %v1035_v46, %v1034_v39 }
 0x38a   :  { %v1017_v48 = vadd.f32 %v1016_v43, %v1015_v38  ;;  %v1024_v49 = vadd.f32 %v1023_v45, %v1022_v57 }
 0x38b   :  { %v1030_v52 = vrot.slane %v1029_v47, 1  ;;  %v1037_v29 = vrot.slane %v1036_v50, 1 }
 0x38c   :  { %v1052_v53 = vsel %vm898_vm14, %v1017_v48, %v1051_v51 }
 0x38d   :  { %v1031_v54 = vadd.f32 %v1030_v52, %v1029_v47  ;;  %v1053_v55 = vsel %vm900_vm15, %v1024_v49, %v1052_v53  ;;  %v1038_v56 = vadd.f32 %v1037_v29, %v1036_v50 }
 0x38f   :  { %v1054_v58 = vsel %vm902_vm0, %v1031_v54, %v1053_v55 }
 0x390   :  { %v1055_v59 = vsel %vm904_vm2, %v1038_v56, %v1054_v58 }
 0x391   :  { %v1057_v2 = vsel %vm85_vm1, %v1055_v59, 0.0 }
 0x392   :  { %1058 = vst [vmem:[%s1511_s8] sm:$0xff] %v1057_v2 }

</bundles_post_ra>
